<compile_context>
chip_gen: v5e
topology: v5e:2x2
jax: 0.10.0
libtpu: 0.0.40
codegen_flags: <defaults>
</compile_context>

<pallas_src>
import functools
import math

import jax
import jax.numpy as jnp
from jax.experimental import pallas as pl
from jax.experimental.pallas import tpu as pltpu


# ---------------------------------------------------------------------------
# helpers
# ---------------------------------------------------------------------------

def _round_up(a, b):
    return ((a + b - 1) // b) * b


def _fold_bn(gamma, beta, mean, var, eps=1e-5):
    """Eval-mode BatchNorm -> per-channel (scale, bias)."""
    scale = gamma / jnp.sqrt(var + eps)
    bias = beta - mean * scale
    return scale, bias


def _silu(y):
    # EUP-friendly SiLU: exp and the approximate reciprocal both run on the EUP slot.
    return y * pl.reciprocal(1.0 + jnp.exp(-y), approx=True)


def _leaky(y):
    return jnp.maximum(y, 0.1 * y)            # LeakyReLU(0.1)


def _vmem_limit(block_bytes):
    # double-buffered blocks + headroom; capped at 48 MiB so it always fits v7x's 64 MiB VMEM.
    return int(min(max(2 * block_bytes + (4 << 20), 16 << 20), 48 << 20))


def _choose_tm(m, bytes_per_row, *, target=4 << 20, align=256):
    """MXU-aligned rows per block (~`target` bytes) with >= 2 grid steps when possible."""
    tm = max(align, ((target // max(bytes_per_row, 1)) // align) * align)
    if tm >= m:
        tm = m if m < 2 * align else _round_up(pl.cdiv(m, 2), align)
    return min(tm, m)


def _choose_rows(batch, h, wp, c, *, budget=12 << 20):
    """Output rows per spatial tile of the fused bottleneck kernel (VMEM-budget based)."""
    per_row = 24 * wp * max(c, 8)              # rough VMEM bytes per output row in the kernel
    r = max(1, min(h, budget // per_row))
    n_t = pl.cdiv(h, r)
    if batch * n_t < 2 and h >= 16:            # keep both v7x TensorCores busy
        n_t = 2
    r = pl.cdiv(h, n_t)
    return r, n_t


# ---------------------------------------------------------------------------
# fused pointwise (1x1) conv:  out = act(x @ W' + b),  W' = W * bn_scale (bf16)
# ---------------------------------------------------------------------------

def _pointwise_kernel(x_ref, w_ref, b_ref, o_ref, *, act):
    xb = x_ref[...].astype(jnp.bfloat16)
    y = jnp.dot(xb, w_ref[...], preferred_element_type=jnp.float32) + b_ref[...]
    if act == "silu":
        y = _silu(y)
    elif act == "leaky":
        y = _leaky(y)
    o_ref[...] = y.astype(o_ref.dtype)


def pointwise_conv(x2d, w_bf16, bias, *, act, out_dtype):
    m, cin = x2d.shape
    cout = w_bf16.shape[1]
    b2 = bias.reshape(1, cout).astype(jnp.float32)
    tm = _choose_tm(m, 4 * cin + 6 * cout)
    grid = (pl.cdiv(m, tm),)

    block_bytes = tm * (x2d.dtype.itemsize * cin + 6 * cout) + 2 * cin * cout + 4 * cout
    cost = pl.CostEstimate(
        flops=int(2 * m * cin * cout),
        transcendentals=int(2 * m * cout if act == "silu" else 0),
        bytes_accessed=int(m * (x2d.dtype.itemsize * cin + jnp.dtype(out_dtype).itemsize * cout)
                           + 2 * cin * cout + 4 * cout),
    )
    return pl.pallas_call(
        functools.partial(_pointwise_kernel, act=act),
        out_shape=jax.ShapeDtypeStruct((m, cout), out_dtype),
        grid_spec=pltpu.PrefetchScalarGridSpec(
            num_scalar_prefetch=0,
            grid=grid,
            in_specs=[
                pl.BlockSpec((tm, cin), lambda i: (i, 0)),
                pl.BlockSpec((cin, cout), lambda i: (0, 0)),
                pl.BlockSpec((1, cout), lambda i: (0, 0)),
            ],
            out_specs=pl.BlockSpec((tm, cout), lambda i: (i, 0)),
        ),
        compiler_params=pltpu.CompilerParams(
            dimension_semantics=("parallel",),
            vmem_limit_bytes=_vmem_limit(block_bytes),
        ),
        cost_estimate=cost,
    )(x2d, w_bf16, b2)


# ---------------------------------------------------------------------------
# fused Bottleneck block: 1x1(+BN+SiLU) prologue -> 3x3(+BN+SiLU) -> (+residual)
# spatially tiled: grid = (B * n_row_tiles,), haloed (R+2, Wp, C) input row tiles
# ---------------------------------------------------------------------------

_TAPS = ((-1, -1), (-1, 0), (-1, 1), (0, -1), (0, 0), (0, 1), (1, -1), (1, 0), (1, 1))


def _bottleneck_kernel(x_ref, w1_ref, b1_ref, w9_ref, b2_ref, o_ref, *,
                       H, W, Wp, R, n_t, shortcut):
    t_idx = pl.program_id(0) % n_t             # row-tile index within the image
    rp2 = R + 2
    cin = x_ref.shape[-1]
    cmid = w1_ref.shape[1]
    cout = w9_ref.shape[2]

    x3 = x_ref[...]                             # (R+2, Wp, cin) bf16, zero spatial padding

    # --- prologue: Bottleneck.cv1 (1x1 conv, BN folded, SiLU) computed entirely in VMEM ----
    t = jnp.dot(x3.reshape(rp2 * Wp, cin), w1_ref[...],
                preferred_element_type=jnp.float32) + b1_ref[...]
    t = _silu(t).reshape(rp2, Wp, cmid)

    # the 3x3 zero-padding must apply to t itself (silu(b1) != 0 on padded positions)
    row = jax.lax.broadcasted_iota(jnp.int32, (rp2, Wp, 1), 0)
    col = jax.lax.broadcasted_iota(jnp.int32, (rp2, Wp, 1), 1)
    g = t_idx * R + row                         # global padded-row index
    valid = (col >= 1) & (col <= W) & (g >= 1) & (g <= H)
    t3 = jnp.where(valid, t, 0.0).astype(jnp.bfloat16)

    # --- 3x3 conv (pad=1, stride=1), BN folded into w9/b2, f32 accumulation -----------------
    # TODO(synk): for cin < 128 an in-VMEM im2col (packing taps along K) would raise MXU
    #             utilisation; kept as 9 shifted matmuls for simplicity.
    acc = jnp.zeros((R * W, cout), jnp.float32)
    for k, (dh, dw) in enumerate(_TAPS):
        xs = t3[1 + dh:1 + dh + R, 1 + dw:1 + dw + W, :].reshape(R * W, cmid)
        acc = acc + jnp.dot(xs, w9_ref[k], preferred_element_type=jnp.float32)
    y = _silu(acc + b2_ref[...])

    # --- residual add fused into the epilogue ------------------------------------------------
    if shortcut:
        res = x3[1:1 + R, 1:1 + W, :].reshape(R * W, cin).astype(jnp.float32)
        y = y + res
    o_ref[...] = y.astype(o_ref.dtype)


def bottleneck_block(a, w1_bf16, b1, w9_bf16, b2, *, shortcut):
    """One fused YOLOv5 Bottleneck (NHWC in / NHWC out, bf16 activations)."""
    # TODO(synk): grouped 3x3 conv (g > 1) not implemented; BottleneckCSP default is g=1.
    B, H, W, c = a.shape
    cmid = w1_bf16.shape[1]
    cout = w9_bf16.shape[2]
    Wp = _round_up(W + 2, 8)                    # 8-aligned padded width -> aligned row shifts
    R, n_t = _choose_rows(B, H, Wp, max(c, cmid, cout))
    H_t = n_t * R

    # single zero-pad + halo'd row tiles (one gather); output is written unpadded.
    ap = jnp.pad(a, ((0, 0), (1, 1 + H_t - H), (1, Wp - W - 1), (0, 0)))
    row_idx = jnp.arange(n_t)[:, None] * R + jnp.arange(R + 2)[None, :]
    a_tiles = ap[:, row_idx].reshape(B * n_t, R + 2, Wp, c)

    b1r = b1.reshape(1, cmid).astype(jnp.float32)
    b2r = b2.reshape(1, cout).astype(jnp.float32)

    block_bytes = (2 * (R + 2) * Wp * c + 2 * R * W * cout
                   + 6 * (R + 2) * Wp * cmid + 4 * R * W * cout
                   + 2 * (c * cmid + 9 * cmid * cout))
    cost = pl.CostEstimate(
        flops=int(B * n_t * (2 * (R + 2) * Wp * c * cmid + 18 * R * W * cmid * cout)),
        transcendentals=int(2 * B * n_t * ((R + 2) * Wp * cmid + R * W * cout)),
        bytes_accessed=int(2 * B * n_t * ((R + 2) * Wp * c + R * W * cout)
                           + 2 * (c * cmid + 9 * cmid * cout)),
    )
    out = pl.pallas_call(
        functools.partial(_bottleneck_kernel, H=H, W=W, Wp=Wp, R=R, n_t=n_t,
                          shortcut=bool(shortcut and c == cout)),
        out_shape=jax.ShapeDtypeStruct((B * n_t, R * W, cout), jnp.bfloat16),
        grid_spec=pltpu.PrefetchScalarGridSpec(
            num_scalar_prefetch=0,
            grid=(B * n_t,),
            in_specs=[
                pl.BlockSpec((None, R + 2, Wp, c), lambda i: (i, 0, 0, 0)),
                pl.BlockSpec((c, cmid), lambda i: (0, 0)),
                pl.BlockSpec((1, cmid), lambda i: (0, 0)),
                pl.BlockSpec((9, cmid, cout), lambda i: (0, 0, 0)),
                pl.BlockSpec((1, cout), lambda i: (0, 0)),
            ],
            out_specs=pl.BlockSpec((None, R * W, cout), lambda i: (i, 0, 0)),
        ),
        compiler_params=pltpu.CompilerParams(
            dimension_semantics=("parallel",),
            vmem_limit_bytes=_vmem_limit(block_bytes),
        ),
        cost_estimate=cost,
    )(a_tiles, w1_bf16, b1r, w9_bf16, b2r)

    out = out.reshape(B, H_t, W, cout)
    return out[:, :H] if H_t != H else out


# ---------------------------------------------------------------------------
# fused CSP tail: cv3 + cv2 + post-concat BN + LeakyReLU + cv4(+BN+SiLU)
# (cat(y1, y2) realised as a split matmul; y1/y2 never leave VMEM)
# ---------------------------------------------------------------------------

def _tail_kernel(x_ref, a_ref, w2_ref, bc2_ref, w3_ref, bc1_ref,
                 w4a_ref, w4b_ref, b4_ref, o_ref):
    xb = x_ref[...].astype(jnp.bfloat16)
    y2 = _leaky(jnp.dot(xb, w2_ref[...], preferred_element_type=jnp.float32) + bc2_ref[...])
    y1 = _leaky(jnp.dot(a_ref[...], w3_ref[...], preferred_element_type=jnp.float32)
                + bc1_ref[...])
    z = jnp.dot(y1.astype(jnp.bfloat16), w4a_ref[...], preferred_element_type=jnp.float32)
    z = z + jnp.dot(y2.astype(jnp.bfloat16), w4b_ref[...], preferred_element_type=jnp.float32)
    o_ref[...] = _silu(z + b4_ref[...]).astype(o_ref.dtype)


def csp_tail(x2d, a2d, w2, bc2, w3, bc1, w4a, w4b, b4, *, out_dtype):
    m, c1 = x2d.shape
    c_ = a2d.shape[1]
    c2 = w4a.shape[1]
    bc1r = bc1.reshape(1, c_).astype(jnp.float32)
    bc2r = bc2.reshape(1, c_).astype(jnp.float32)
    b4r = b4.reshape(1, c2).astype(jnp.float32)

    obytes = jnp.dtype(out_dtype).itemsize
    tm = _choose_tm(m, 4 * c1 + 2 * c_ + 12 * c_ + 4 * c2 + obytes * c2)
    grid = (pl.cdiv(m, tm),)

    wbytes = 2 * (c1 * c_ + c_ * c_ + 2 * c_ * c2)
    block_bytes = tm * (4 * c1 + 2 * c_ + 12 * c_ + 4 * c2 + obytes * c2) + wbytes + 4 * (2 * c_ + c2)
    cost = pl.CostEstimate(
        flops=int(2 * m * (c1 * c_ + c_ * c_ + 2 * c_ * c2)),
        transcendentals=int(2 * m * c2),
        bytes_accessed=int(m * (4 * c1 + 2 * c_ + obytes * c2) + wbytes),
    )
    return pl.pallas_call(
        _tail_kernel,
        out_shape=jax.ShapeDtypeStruct((m, c2), out_dtype),
        grid_spec=pltpu.PrefetchScalarGridSpec(
            num_scalar_prefetch=0,
            grid=grid,
            in_specs=[
                pl.BlockSpec((tm, c1), lambda i: (i, 0)),
                pl.BlockSpec((tm, c_), lambda i: (i, 0)),
                pl.BlockSpec((c1, c_), lambda i: (0, 0)),
                pl.BlockSpec((1, c_), lambda i: (0, 0)),
                pl.BlockSpec((c_, c_), lambda i: (0, 0)),
                pl.BlockSpec((1, c_), lambda i: (0, 0)),
                pl.BlockSpec((c_, c2), lambda i: (0, 0)),
                pl.BlockSpec((c_, c2), lambda i: (0, 0)),
                pl.BlockSpec((1, c2), lambda i: (0, 0)),
            ],
            out_specs=pl.BlockSpec((tm, c2), lambda i: (i, 0)),
        ),
        compiler_params=pltpu.CompilerParams(
            dimension_semantics=("parallel",),
            vmem_limit_bytes=_vmem_limit(block_bytes),
        ),
        cost_estimate=cost,
    )(x2d, a2d, w2, bc2r, w3, bc1r, w4a, w4b, b4r)


# ---------------------------------------------------------------------------
# BottleneckCSP forward (Pallas path) and pure-JAX reference
# ---------------------------------------------------------------------------

def bottleneck_csp_forward(x_nchw, params, *, shortcut=True, eps=1e-5):
    """x_nchw: (B, c1, H, W) float32.  Returns (B, c2, H, W)."""
    # TODO(synk): BatchNorm implemented in eval mode (running-stats affine), not train mode.
    B, c1, H, W = x_nchw.shape
    x = jnp.transpose(x_nchw, (0, 2, 3, 1))                 # NHWC (channels on lanes)
    M = B * H * W
    x2d = x.reshape(M, c1)

    c_ = params["cv1"]["w"].shape[1]
    c2 = params["cv4"]["w"].shape[1]

    # fold every BN scale into bf16 weight columns at trace time; keep biases in f32
    s1, b1 = _fold_bn(*params["cv1"]["bn"], eps)
    w1 = (params["cv1"]["w"] * s1).astype(jnp.bfloat16)

    sc, bc = _fold_bn(*params["bn_cat"], eps)
    w3 = (params["cv3_w"] * sc[:c_]).astype(jnp.bfloat16)   # cv3 + post-cat BN (upper half)
    w2 = (params["cv2_w"] * sc[c_:]).astype(jnp.bfloat16)   # cv2 + post-cat BN (lower half)

    s4, b4 = _fold_bn(*params["cv4"]["bn"], eps)
    w4 = (params["cv4"]["w"] * s4).astype(jnp.bfloat16)

    # cv1: 1x1 conv + BN + SiLU  (bf16 activations from here on)
    a2d = pointwise_conv(x2d, w1, b1, act="silu", out_dtype=jnp.bfloat16)
    a = a2d.reshape(B, H, W, c_)

    # m: n fused Bottleneck blocks
    for blk in params["m"]:
        sb1, bb1 = _fold_bn(*blk["cv1"]["bn"], eps)
        wb1 = (blk["cv1"]["w"] * sb1).astype(jnp.bfloat16)
        sb2, bb2 = _fold_bn(*blk["cv2"]["bn"], eps)
        wb9 = (blk["cv2"]["w"] * sb2).reshape(9, c_, c_).astype(jnp.bfloat16)
        a = bottleneck_block(a, wb1, bb1, wb9, bb2, shortcut=shortcut)

    # tail: cv3 / cv2 / post-concat BN + LeakyReLU / cv4(+BN+SiLU) in one kernel
    out2d = csp_tail(x2d, a.reshape(M, c_), w2, bc[c_:], w3, bc[:c_],
                     w4[:c_], w4[c_:], b4, out_dtype=x_nchw.dtype)
    return jnp.transpose(out2d.reshape(B, H, W, c2), (0, 3, 1, 2))


def bottleneck_csp_reference(x_nchw, params, *, shortcut=True, eps=1e-5):
    """Pure-JAX f32 reference of the PyTorch forward (eval-mode BN)."""
    x = jnp.transpose(x_nchw, (0, 2, 3, 1))

    def conv1x1(v, w):
        return jax.lax.conv_general_dilated(
            v, w[None, None], (1, 1), "VALID",
            dimension_numbers=("NHWC", "HWIO", "NHWC"))

    def conv3x3(v, w):
        return jax.lax.conv_general_dilated(
            v, w, (1, 1), "SAME",
            dimension_numbers=("NHWC", "HWIO", "NHWC"))

    def bn(v, p):
        g, bta, mean, var = p
        return (v - mean) * (g / jnp.sqrt(var + eps)) + bta

    silu = lambda v: v * jax.nn.sigmoid(v)
    leaky = lambda v: jnp.maximum(v, 0.1 * v)

    a = silu(bn(conv1x1(x, params["cv1"]["w"]), params["cv1"]["bn"]))
    for blk in params["m"]:
        t = silu(bn(conv1x1(a, blk["cv1"]["w"]), blk["cv1"]["bn"]))
        u = silu(bn(conv3x3(t, blk["cv2"]["w"]), blk["cv2"]["bn"]))
        a = a + u if shortcut else u
    y1 = conv1x1(a, params["cv3_w"])
    y2 = conv1x1(x, params["cv2_w"])
    z = leaky(bn(jnp.concatenate([y1, y2], axis=-1), params["bn_cat"]))
    out = silu(bn(conv1x1(z, params["cv4"]["w"]), params["cv4"]["bn"]))
    return jnp.transpose(out, (0, 3, 1, 2))


# ---------------------------------------------------------------------------
# deterministic parameter construction
# ---------------------------------------------------------------------------

def make_params(key, c1, c2, n=1, e=0.5):
    c_ = int(c2 * e)

    def nxt():
        nonlocal key
        key, sub = jax.random.split(key)
        return sub

    def conv_w(cin, cout):
        return jax.random.normal(nxt(), (cin, cout), jnp.float32) / math.sqrt(cin)

    def conv3_w(cin, cout):
        return jax.random.normal(nxt(), (3, 3, cin, cout), jnp.float32) / math.sqrt(9 * cin)

    def bn_p(c):
        g = jax.random.uniform(nxt(), (c,), jnp.float32, 0.5, 1.5)
        bta = jax.random.normal(nxt(), (c,), jnp.float32) * 0.1
        mean = jax.random.normal(nxt(), (c,), jnp.float32) * 0.1
        var = jax.random.uniform(nxt(), (c,), jnp.float32, 0.5, 1.5)
        return (g, bta, mean, var)

    return {
        "cv1": {"w": conv_w(c1, c_), "bn": bn_p(c_)},
        "cv2_w": conv_w(c1, c_),
        "cv3_w": conv_w(c_, c_),
        "cv4": {"w": conv_w(2 * c_, c2), "bn": bn_p(c2)},
        "bn_cat": bn_p(2 * c_),
        "m": [
            {"cv1": {"w": conv_w(c_, c_), "bn": bn_p(c_)},
             "cv2": {"w": conv3_w(c_, c_), "bn": bn_p(c_)}}
            for _ in range(n)
        ],
    }


if __name__ == "__main__":
    B, C1, C2, H, W = 2, 8, 8, 16, 16              # c_ = int(C2 * 0.5) = 4
    key = jax.random.PRNGKey(0)
    key, xkey = jax.random.split(key)
    x = jax.random.normal(xkey, (B, C1, H, W), dtype=jnp.float32)
    params = make_params(key, C1, C2, n=2, e=0.5)

    out = jax.block_until_ready(bottleneck_csp_forward(x, params, shortcut=True))
    ref = bottleneck_csp_reference(x, params, shortcut=True)

    assert out.shape == (B, C2, H, W) and out.dtype == x.dtype
    max_err = float(jnp.max(jnp.abs(out - ref)))
    # bf16 MXU operands / bf16 intermediate activations -> loosened tolerance vs f32 reference
    assert bool(jnp.allclose(out, ref, atol=5e-2, rtol=5e-2)), f"mismatch vs reference: {max_err}"

    print("KERNEL_OK")
</pallas_src>

<mosaic_0001>
module attributes {stable_mosaic.version = 11 : i64} {
  func.func @_pointwise_kernel(%arg0: i32, %arg1: memref<256x8xf32, #tpu.memory_space<vmem>>, %arg2: memref<8x4xbf16, #tpu.memory_space<vmem>>, %arg3: memref<1x4xf32, #tpu.memory_space<vmem>>, %arg4: memref<256x4xbf16, #tpu.memory_space<vmem>>) attributes {dimension_semantics = [#tpu.dimension_semantics<parallel>], iteration_bounds = array<i64: 2>, scalar_prefetch = 0 : i64, scratch_operands = 0 : i64, tpu.core_type = #tpu.core_type<tc>, window_params = [{transform_indices = @transform_0, window_bounds = array<i64: 256, 8>}, {pipeline_mode = #tpu.pipeline_mode<synchronous>, transform_indices = @transform_1, window_bounds = array<i64: 8, 4>}, {pipeline_mode = #tpu.pipeline_mode<synchronous>, transform_indices = @transform_2, window_bounds = array<i64: 1, 4>}, {transform_indices = @transform_3, window_bounds = array<i64: 256, 4>}]} {
    %c0 = arith.constant 0 : index
    %c0_0 = arith.constant 0 : index
    %0 = vector.load %arg1[%c0, %c0_0] : memref<256x8xf32, #tpu.memory_space<vmem>>, vector<256x8xf32>
    %1 = arith.truncf %0 : vector<256x8xf32> to vector<256x8xbf16>
    %c0_1 = arith.constant 0 : index
    %c0_2 = arith.constant 0 : index
    %2 = vector.load %arg2[%c0_1, %c0_2] : memref<8x4xbf16, #tpu.memory_space<vmem>>, vector<8x4xbf16>
    %cst = arith.constant dense<0.000000e+00> : vector<256x4xf32>
    %3 = tpu.matmul %1, %2, %cst {dimension_numbers = #tpu.dot_dimension_numbers<[1], [0], [0], [1], [0, 0, 1, 1], [], []>} : vector<256x8xbf16>, vector<8x4xbf16>, vector<256x4xf32> -> vector<256x4xf32>
    %c0_3 = arith.constant 0 : index
    %c0_4 = arith.constant 0 : index
    %4 = vector.load %arg3[%c0_3, %c0_4] : memref<1x4xf32, #tpu.memory_space<vmem>>, vector<1x4xf32>
    %5 = vector.broadcast %4 : vector<1x4xf32> to vector<256x4xf32>
    %6 = arith.addf %3, %5 : vector<256x4xf32>
    %cst_5 = arith.constant 0.000000e+00 : f32
    %7 = vector.broadcast %cst_5 : f32 to vector<256x4xf32>
    %8 = arith.subf %7, %6 : vector<256x4xf32>
    %9 = math.exp %8 : vector<256x4xf32>
    %cst_6 = arith.constant 1.000000e+00 : f32
    %10 = vector.broadcast %cst_6 : f32 to vector<256x4xf32>
    %11 = arith.addf %10, %9 : vector<256x4xf32>
    %12 = tpu.reciprocal %11 {approx = true} : vector<256x4xf32> -> vector<256x4xf32>
    %13 = arith.mulf %6, %12 : vector<256x4xf32>
    %14 = arith.truncf %13 : vector<256x4xf32> to vector<256x4xbf16>
    %c0_7 = arith.constant 0 : index
    %c0_8 = arith.constant 0 : index
    %15 = vector.load %arg4[%c0_7, %c0_8] : memref<256x4xbf16, #tpu.memory_space<vmem>>, vector<256x4xbf16>
    tpu.vector_store %arg4[%c0_7, %c0_8], %14 {strides = array<i32>} : memref<256x4xbf16, #tpu.memory_space<vmem>>, vector<256x4xbf16>,
    return
  }
  func.func @transform_0(%arg0: i32) -> (i32, i32) {
    %c0_i32 = arith.constant 0 : i32
    %c0_i32_0 = arith.constant 0 : i32
    return %arg0, %c0_i32 : i32, i32
  }
  func.func @transform_1(%arg0: i32) -> (i32, i32) {
    %c0_i32 = arith.constant 0 : i32
    %c0_i32_0 = arith.constant 0 : i32
    %c0_i32_1 = arith.constant 0 : i32
    return %c0_i32, %c0_i32_0 : i32, i32
  }
  func.func @transform_2(%arg0: i32) -> (i32, i32) {
    %c0_i32 = arith.constant 0 : i32
    %c0_i32_0 = arith.constant 0 : i32
    %c0_i32_1 = arith.constant 0 : i32
    return %c0_i32, %c0_i32_0 : i32, i32
  }
  func.func @transform_3(%arg0: i32) -> (i32, i32) {
    %c0_i32 = arith.constant 0 : i32
    %c0_i32_0 = arith.constant 0 : i32
    return %arg0, %c0_i32 : i32, i32
  }
}

</mosaic_0001>

<bundles_post_ra>
// kernel: tpu_custom_call.1
= control target key start
LH: loop header
LB: loop body
LE: loop exit
PB: predicated region body
PF: predicated region fallthrough
CT: control target
= control target key end

     0   :  { %s878_s12 = smov 0   ;;  %s1175_s0 = inlined_call_operand.vmem [shape: f32[512,8], index: 0, kind: input, shape index: {}]   ;;  %s1176_s1 = inlined_call_operand.vmem [shape: bf16[8,4], index: 1, kind: input, shape index: {}]   ;;  %s1177_s2 = inlined_call_operand.vmem [shape: f32[1,4], index: 2, kind: input, shape index: {}]   ;;  %s1178_s3 = inlined_call_operand.vmem [shape: bf16[512,4], index: 3, kind: output, shape index: {}]  }
   0x1 LB: > { %s683_s13 = sadd.s32 4294967295, %s856_s12   ;;  %p687_p0 = scmp.ge.s32.totalorder %s856_s12, 1  ;;  %s856_s12 = sphi %s878_s12, %s13_s12  }
   0x2   : > { %p138_p1 = scmp.lt.s32.totalorder %s856_s12, 3 }
   0x4   : > { %p139_p2 = pnand %p687_p0, %p138_p1 }
   0x5   : > { %s688_s16 = sshll.u32 (!%p139_p2), %s683_s13, 5 }
   0x6   : > { %142 = sbr.rel (%p139_p2) target bundleno = 241 (0xf1), region = 32  ;;  %p163_p3 = scmp.lt.s32.totalorder (!%p139_p2), %s688_s16, 63 }
   0xb   : > { %v223_v0 = vld [vmem:[%s1176_s1] sm:$0xf]  ;;  %vm277_vm0 = vcmask 1043456   ;;  %s1180_s16 = smov (!%p163_p3, %s688_s16), 63  ;;  %vm228_vm1 = vcmask 64512   ;;  %vm594_vm2 = vcmask 27648  }
   0xc   : > { %v279_v1 = vsel %vm277_vm0, %v223_v0, 0  ;;  %s689_s17 = sshll.u32 %s1180_s16, 3  ;;  %v948_v50 = vld [vmem:[%s1177_s2] ss:$0 sm:$0xff]  ;;  %s691_s23 = sshll.u32 %s1180_s16, 2 }
   0xd   : > { %288 = vmatpush.bf16.msra.mxu0 %v279_v1  ;;  %710 = vmatpush.bf16.msra.mxu1 %v279_v1  ;;  %s895_s20 = scalar_lea.vmem %s1175_s0, %s689_s17  ;;  %s988_s26 = scalar_lea.vmem %s1178_s3, %s691_s23 }
   0xe   : > { %711 = vmatpush.bf16.msra.mxu2 %v279_v1  ;;  %712 = vmatpush.bf16.msra.mxu3 %v279_v1  ;;  %v175_v2 = vld [vmem:[%s895_s20] sm:$0xff]  ;;  %v176_v3 = vld [vmem:[%s895_s20 + $0x8] sm:$0xff]  ;;  %v177_v14 = vld [vmem:[%s895_s20 + $0x10] sm:$0xff] }
   0xf   : > { %v183_v4 = vld [vmem:[%s895_s20 + $0x40] sm:$0xff]  ;;  %v207_v5 = vpack.c.bf16 %v176_v3, %v175_v2  ;;  %v184_v6 = vld [vmem:[%s895_s20 + $0x48] sm:$0xff]  ;;  %v178_v15 = vld [vmem:[%s895_s20 + $0x18] sm:$0xff] }
  0x10   : > { %v191_v7 = vld [vmem:[%s895_s20 + $0x80] sm:$0xff]  ;;  %v192_v8 = vld [vmem:[%s895_s20 + $0x88] sm:$0xff]  ;;  %v211_v9 = vpack.c.bf16 %v184_v6, %v183_v4  ;;  %v185_v16 = vld [vmem:[%s895_s20 + $0x50] sm:$0xff]  ;;  %v208_v22 = vpack.c.bf16 %v178_v15, %v177_v14 }
  0x11   : > { %v215_v10 = vpack.c.bf16 %v192_v8, %v191_v7  ;;  %v199_v11 = vld [vmem:[%s895_s20 + $0xc0] sm:$0xff]  ;;  %v200_v12 = vld [vmem:[%s895_s20 + $0xc8] sm:$0xff]  ;;  %692 = vmatmul.msk.bf16.vlgmr.msra.gmra.mxu0 %vm228_vm1, %v207_v5  ;;  %v186_v17 = vld [vmem:[%s895_s20 + $0x58] sm:$0xff] }
  0x12   : > { %v219_v13 = vpack.c.bf16 %v200_v12, %v199_v11  ;;  %696 = vmatmul.msk.bf16.vlgmr.msra.gmra.mxu1 %vm228_vm1, %v211_v9  ;;  %v193_v18 = vld [vmem:[%s895_s20 + $0x90] sm:$0xff]  ;;  %v194_v19 = vld [vmem:[%s895_s20 + $0x98] sm:$0xff]  ;;  %v212_v23 = vpack.c.bf16 %v186_v17, %v185_v16  ;;  %v179_v26 = vld [vmem:[%s895_s20 + $0x20] sm:$0xff] }
  0x13   : > { %700 = vmatmul.msk.bf16.vlgmr.msra.gmra.mxu2 %vm228_vm1, %v215_v10  ;;  %v201_v20 = vld [vmem:[%s895_s20 + $0xd0] sm:$0xff]  ;;  %v202_v21 = vld [vmem:[%s895_s20 + $0xd8] sm:$0xff]  ;;  %v216_v24 = vpack.c.bf16 %v194_v19, %v193_v18  ;;  %v180_v27 = vld [vmem:[%s895_s20 + $0x28] sm:$0xff] }
  0x14   : > { %704 = vmatmul.msk.bf16.vlgmr.msra.gmra.mxu3 %vm228_vm1, %v219_v13  ;;  %v220_v25 = vpack.c.bf16 %v202_v21, %v201_v20  ;;  %v187_v28 = vld [vmem:[%s895_s20 + $0x60] sm:$0xff]  ;;  %v188_v29 = vld [vmem:[%s895_s20 + $0x68] sm:$0xff]  ;;  %v209_v34 = vpack.c.bf16 %v180_v27, %v179_v26  ;;  %v181_v38 = vld [vmem:[%s895_s20 + $0x30] sm:$0xff] }
  0x15   : > { %v195_v30 = vld [vmem:[%s895_s20 + $0xa0] sm:$0xff]  ;;  %v196_v31 = vld [vmem:[%s895_s20 + $0xa8] sm:$0xff]  ;;  %v213_v35 = vpack.c.bf16 %v188_v29, %v187_v28  ;;  %v182_v39 = vld [vmem:[%s895_s20 + $0x38] sm:$0xff] }
  0x16   : > { %v203_v32 = vld [vmem:[%s895_s20 + $0xe0] sm:$0xff]  ;;  %v204_v33 = vld [vmem:[%s895_s20 + $0xe8] sm:$0xff]  ;;  %v217_v36 = vpack.c.bf16 %v196_v31, %v195_v30  ;;  %v189_v40 = vld [vmem:[%s895_s20 + $0x70] sm:$0xff]  ;;  %v210_v46 = vpack.c.bf16 %v182_v39, %v181_v38 }
  0x17   : > { %v221_v37 = vpack.c.bf16 %v204_v33, %v203_v32  ;;  %v190_v41 = vld [vmem:[%s895_s20 + $0x78] sm:$0xff]  ;;  %v197_v42 = vld [vmem:[%s895_s20 + $0xb0] sm:$0xff] }
  0x18   : > { %v198_v43 = vld [vmem:[%s895_s20 + $0xb8] sm:$0xff]  ;;  %v205_v44 = vld [vmem:[%s895_s20 + $0xf0] sm:$0xff]  ;;  %v214_v47 = vpack.c.bf16 %v190_v41, %v189_v40 }
  0x19   : > { %v206_v45 = vld [vmem:[%s895_s20 + $0xf8] sm:$0xff]  ;;  %v218_v48 = vpack.c.bf16 %v198_v43, %v197_v42 }
  0x1a   : > { %v222_v49 = vpack.c.bf16 %v206_v45, %v205_v44 }
  0x21   : > { %693 = vmatmul.msk.bf16.gmra.mxu0 %vm228_vm1, %v208_v22 }
  0x22   : > { %697 = vmatmul.msk.bf16.gmra.mxu1 %vm228_vm1, %v212_v23 }
  0x23   : > { %701 = vmatmul.msk.bf16.gmra.mxu2 %vm228_vm1, %v216_v24 }
  0x24   : > { %705 = vmatmul.msk.bf16.gmra.mxu3 %vm228_vm1, %v220_v25 }
  0x31   : > { %694 = vmatmul.msk.bf16.gmra.mxu0 %vm228_vm1, %v209_v34 }
  0x32   : > { %698 = vmatmul.msk.bf16.gmra.mxu1 %vm228_vm1, %v213_v35 }
  0x33   : > { %702 = vmatmul.msk.bf16.gmra.mxu2 %vm228_vm1, %v217_v36 }
  0x34   : > { %706 = vmatmul.msk.bf16.gmra.mxu3 %vm228_vm1, %v221_v37 }
  0x41   : > { %695 = vmatmul.msk.bf16.gmra.mxu0 %vm228_vm1, %v210_v46 }
  0x42   : > { %699 = vmatmul.msk.bf16.gmra.mxu1 %vm228_vm1, %v214_v47 }
  0x43   : > { %703 = vmatmul.msk.bf16.gmra.mxu2 %vm228_vm1, %v218_v48 }
  0x44   : > { %707 = vmatmul.msk.bf16.gmra.mxu3 %vm228_vm1, %v222_v49 }
  0x8e   : > { %v290_v51 = vpop.f32.mrf.mxu0 }
  0x8f   : > { %v291_v52 = vadd.f32 %v948_v50, %v290_v51  ;;  %v310_v53 = vpop.f32.mrf.mxu1 }
  0x90   : > { %v311_v54 = vadd.f32 %v948_v50, %v310_v53 }
  0x91   : > { %v370_v55 = vsub.f32 0.0, %v291_v52 }
  0x92   : > { %v378_v56 = vsub.f32 0.0, %v311_v54 }
  0x93   : > { %v402_v57 = vmul.f32 1.442695, %v370_v55 }
  0x94   : > { %v418_v58 = vmul.f32 1.442695, %v378_v56 }
  0x95   : > { %722 = vpow2.f32 %v402_v57 }
  0x96   : > { %v330_v59 = vpop.f32.mrf.mxu2  ;;  %724 = vpow2.f32 %v418_v58  ;;  %v292_v62 = vpop.f32.mrf.mxu0 }
  0x97   : > { %v953_v60 = vadd.f32 %v948_v50, %v330_v59  ;;  %v350_v61 = vpop.f32.mrf.mxu3  ;;  %v959_v0 = vadd.f32 %v948_v50, %v292_v62  ;;  %v312_v1 = vpop.f32.mrf.mxu1 }
  0x98   : > { %v956_v63 = vadd.f32 %v948_v50, %v350_v61  ;;  %v963_v3 = vadd.f32 %v948_v50, %v312_v1 }
  0x99   : > { %v386_v2 = vsub.f32 0.0, %v953_v60  ;;  %v371_v5 = vsub.f32 0.0, %v959_v0 }
  0x9a   : > { %v394_v4 = vsub.f32 0.0, %v956_v63  ;;  %v379_v7 = vsub.f32 0.0, %v963_v3 }
  0x9b   : > { %v434_v6 = vmul.f32 1.442695, %v386_v2  ;;  %v723_v8 = vpop.eup %722  ;;  %v404_v12 = vmul.f32 1.442695, %v371_v5 }
  0x9c   : > { %v450_v9 = vmul.f32 1.442695, %v394_v4  ;;  %v725_v10 = vpop.eup %724  ;;  %v466_v11 = vadd.f32 1.0, %v723_v8  ;;  %v420_v14 = vmul.f32 1.442695, %v379_v7 }
  0x9d   : > { %726 = vpow2.f32 %v434_v6  ;;  %v474_v13 = vadd.f32 1.0, %v725_v10 }
  0x9e   : > { %728 = vpow2.f32 %v450_v9  ;;  %v332_v15 = vpop.f32.mrf.mxu2  ;;  %v295_v18 = vpop.f32.mrf.mxu0 }
  0x9f   : > { %730 = vrcp.f32 %v466_v11  ;;  %v969_v16 = vadd.f32 %v948_v50, %v332_v15  ;;  %v352_v17 = vpop.f32.mrf.mxu3  ;;  %v975_v20 = vadd.f32 %v948_v50, %v295_v18  ;;  %v315_v21 = vpop.f32.mrf.mxu1 }
  0xa0   : > { %732 = vrcp.f32 %v474_v13  ;;  %v972_v19 = vadd.f32 %v948_v50, %v352_v17  ;;  %v979_v23 = vadd.f32 %v948_v50, %v315_v21 }
  0xa1   : > { %734 = vpow2.f32 %v404_v12  ;;  %v387_v22 = vsub.f32 0.0, %v969_v16  ;;  %v372_v25 = vsub.f32 0.0, %v975_v20 }
  0xa2   : > { %736 = vpow2.f32 %v420_v14  ;;  %v395_v24 = vsub.f32 0.0, %v972_v19  ;;  %v380_v28 = vsub.f32 0.0, %v979_v23 }
  0xa3   : > { %v727_v26 = vpop.eup %726  ;;  %v436_v27 = vmul.f32 1.442695, %v387_v22  ;;  %v406_v34 = vmul.f32 1.442695, %v372_v25 }
  0xa4   : > { %v729_v29 = vpop.eup %728  ;;  %v482_v30 = vadd.f32 1.0, %v727_v26  ;;  %v452_v31 = vmul.f32 1.442695, %v395_v24  ;;  %v422_v40 = vmul.f32 1.442695, %v380_v28 }
  0xa5   : > { %v731_v32 = vpop.eup %730  ;;  %v490_v33 = vadd.f32 1.0, %v729_v29  ;;  %738 = vpow2.f32 %v436_v27 }
  0xa6   : > { %v733_v35 = vpop.eup %732  ;;  %v530_v36 = vmul.f32 %v731_v32, %v291_v52  ;;  %740 = vrcp.f32 %v482_v30  ;;  %v335_v37 = vpop.f32.mrf.mxu2 }
  0xa7   : > { %v735_v38 = vpop.eup %734  ;;  %v538_v39 = vmul.f32 %v733_v35, %v311_v54  ;;  %742 = vrcp.f32 %v490_v33  ;;  %v991_v41 = vadd.f32 %v948_v50, %v335_v37  ;;  %v355_v42 = vpop.f32.mrf.mxu3 }
  0xa8   : > { %v297_v43 = vpop.f32.mrf.mxu0  ;;  %v737_v44 = vpop.eup %736  ;;  %v562_v45 = vpack.c.bf16 %v530_v36, %v530_v36  ;;  %v467_v46 = vadd.f32 1.0, %v735_v38  ;;  %744 = vpow2.f32 %v452_v31  ;;  %v994_v47 = vadd.f32 %v948_v50, %v355_v42 }
  0xa9   : > { %v317_v48 = vpop.f32.mrf.mxu1  ;;  %v570_v49 = vpack.c.bf16 %v538_v39, %v538_v39  ;;  %v475_v51 = vadd.f32 1.0, %v737_v44  ;;  %746 = vpow2.f32 %v406_v34  ;;  %v388_v52 = vsub.f32 0.0, %v991_v41 }
  0xaa   : > { %595 = vst.msk [vmem:[%s988_s26] sm:$0xf] %vm594_vm2, %v562_v45  ;;  %748 = vrcp.f32 %v467_v46  ;;  %v396_v53 = vsub.f32 0.0, %v994_v47  ;;  %v1001_v54 = vadd.f32 %v948_v50, %v297_v43  ;;  %v1004_v55 = vadd.f32 %v948_v50, %v317_v48 }
  0xab   : > { %v739_v56 = vpop.eup %738  ;;  %603 = vst.msk [vmem:[%s988_s26 + $0x20] sm:$0xf] %vm594_vm2, %v570_v49  ;;  %750 = vrcp.f32 %v475_v51  ;;  %v438_v57 = vmul.f32 1.442695, %v388_v52 }
  0xac   : > { %v741_v58 = vpop.eup %740  ;;  %v483_v59 = vadd.f32 1.0, %v739_v56  ;;  %752 = vpow2.f32 %v422_v40  ;;  %v454_v61 = vmul.f32 1.442695, %v396_v53  ;;  %v373_v62 = vsub.f32 0.0, %v1001_v54 }
  0xad   : > { %v743_v1 = vpop.eup %742  ;;  %v546_v2 = vmul.f32 %v741_v58, %v953_v60  ;;  %754 = vpow2.f32 %v438_v57  ;;  %v381_v4 = vsub.f32 0.0, %v1004_v55 }
  0xae   : > { %v745_v5 = vpop.eup %744  ;;  %v554_v6 = vmul.f32 %v743_v1, %v956_v63  ;;  %756 = vrcp.f32 %v483_v59  ;;  %v408_v7 = vmul.f32 1.442695, %v373_v62  ;;  %v337_v8 = vpop.f32.mrf.mxu2 }
  0xaf   : > { %v747_v9 = vpop.eup %746  ;;  %v578_v10 = vpack.c.bf16 %v546_v2, %v546_v2  ;;  %v491_v11 = vadd.f32 1.0, %v745_v5  ;;  %758 = vpow2.f32 %v454_v61  ;;  %v424_v12 = vmul.f32 1.442695, %v381_v4  ;;  %v357_v13 = vpop.f32.mrf.mxu3 }
  0xb0   : > { %v300_v14 = vpop.f32.mrf.mxu0  ;;  %v749_v15 = vpop.eup %748  ;;  %v586_v60 = vpack.c.bf16 %v554_v6, %v554_v6  ;;  %v468_v17 = vadd.f32 1.0, %v747_v9  ;;  %760 = vpow2.f32 %v408_v7  ;;  %v1013_v18 = vadd.f32 %v948_v50, %v337_v8 }
  0xb1   : > { %v320_v63 = vpop.f32.mrf.mxu1  ;;  %v751_v21 = vpop.eup %750  ;;  %611 = vst.msk [vmem:[%s988_s26 + $0x40] sm:$0xf] %vm594_vm2, %v578_v10  ;;  %v531_v22 = vmul.f32 %v749_v15, %v959_v0  ;;  %762 = vrcp.f32 %v491_v11  ;;  %v1019_v24 = vadd.f32 %v948_v50, %v357_v13  ;;  %v1022_v25 = vadd.f32 %v948_v50, %v300_v14 }
  0xb2   : > { %v753_v26 = vpop.eup %752  ;;  %619 = vst.msk [vmem:[%s988_s26 + $0x60] sm:$0xf] %vm594_vm2, %v586_v60  ;;  %v539_v27 = vmul.f32 %v751_v21, %v963_v3  ;;  %764 = vrcp.f32 %v468_v17  ;;  %v389_v28 = vsub.f32 0.0, %v1013_v18  ;;  %v1029_v29 = vadd.f32 %v948_v50, %v320_v63 }
  0xb3   : > { %v755_v0 = vpop.eup %754  ;;  %v563_v30 = vpack.c.bf16 %v531_v22, %v531_v22  ;;  %v476_v31 = vadd.f32 1.0, %v753_v26  ;;  %766 = vpow2.f32 %v424_v12  ;;  %v397_v32 = vsub.f32 0.0, %v1019_v24 }
  0xb4   : > { %v757_v33 = vpop.eup %756  ;;  %v571_v34 = vpack.c.bf16 %v539_v27, %v539_v27  ;;  %v484_v35 = vadd.f32 1.0, %v755_v0  ;;  %v440_v36 = vmul.f32 1.442695, %v389_v28  ;;  %v374_v37 = vsub.f32 0.0, %v1022_v25 }
  0xb5   : > { %v759_v3 = vpop.eup %758  ;;  %596 = vst.msk [vmem:[%s988_s26 + $0x4] sm:$0xf] %vm594_vm2, %v563_v30  ;;  %v547_v38 = vmul.f32 %v757_v33, %v969_v16  ;;  %768 = vrcp.f32 %v476_v31  ;;  %v456_v39 = vmul.f32 1.442695, %v397_v32  ;;  %v382_v40 = vsub.f32 0.0, %v1029_v29 }
  0xb6   : > { %v761_v42 = vpop.eup %760  ;;  %604 = vst.msk [vmem:[%s988_s26 + $0x24] sm:$0xf] %vm594_vm2, %v571_v34  ;;  %770 = vrcp.f32 %v484_v35  ;;  %v492_v43 = vadd.f32 1.0, %v759_v3  ;;  %v410_v44 = vmul.f32 1.442695, %v374_v37  ;;  %v340_v45 = vpop.f32.mrf.mxu2 }
  0xb7   : > { %v763_v46 = vpop.eup %762  ;;  %v579_v48 = vpack.c.bf16 %v547_v38, %v547_v38  ;;  %v469_v49 = vadd.f32 1.0, %v761_v42  ;;  %772 = vpow2.f32 %v440_v36  ;;  %v426_v51 = vmul.f32 1.442695, %v382_v40  ;;  %v360_v52 = vpop.f32.mrf.mxu3 }
  0xb8   : > { %v302_v53 = vpop.f32.mrf.mxu0  ;;  %v765_v16 = vpop.eup %764  ;;  %v555_v56 = vmul.f32 %v763_v46, %v972_v19  ;;  %774 = vrcp.f32 %v492_v43  ;;  %v1041_v57 = vadd.f32 %v948_v50, %v340_v45  ;;  %v1044_v58 = vadd.f32 %v948_v50, %v360_v52 }
  0xb9   : > { %v322_v59 = vpop.f32.mrf.mxu1  ;;  %v767_v61 = vpop.eup %766  ;;  %612 = vst.msk [vmem:[%s988_s26 + $0x44] sm:$0xf] %vm594_vm2, %v579_v48  ;;  %v532_v62 = vmul.f32 %v765_v16, %v975_v20  ;;  %776 = vrcp.f32 %v469_v49  ;;  %v1050_v1 = vadd.f32 %v948_v50, %v302_v53 }
  0xba   : > { %v1053_v19 = vadd.f32 %v948_v50, %v322_v59  ;;  %v587_v2 = vpack.c.bf16 %v555_v56, %v555_v56  ;;  %v477_v4 = vadd.f32 1.0, %v767_v61  ;;  %778 = vpow2.f32 %v456_v39 }
  0xbb   : > { %v390_v5 = vsub.f32 0.0, %v1041_v57  ;;  %v769_v6 = vpop.eup %768  ;;  %v564_v7 = vpack.c.bf16 %v532_v62, %v532_v62  ;;  %780 = vpow2.f32 %v410_v44  ;;  %v398_v8 = vsub.f32 0.0, %v1044_v58 }
  0xbc   : > { %v375_v20 = vsub.f32 0.0, %v1050_v1  ;;  %v771_v9 = vpop.eup %770  ;;  %620 = vst.msk [vmem:[%s988_s26 + $0x64] sm:$0xf] %vm594_vm2, %v587_v2  ;;  %v540_v10 = vmul.f32 %v769_v6, %v979_v23  ;;  %782 = vrcp.f32 %v477_v4  ;;  %v383_v12 = vsub.f32 0.0, %v1053_v19 }
  0xbd   : > { %v442_v11 = vmul.f32 1.442695, %v390_v5  ;;  %v773_v13 = vpop.eup %772  ;;  %597 = vst.msk [vmem:[%s988_s26 + $0x8] sm:$0xf] %vm594_vm2, %v564_v7  ;;  %v548_v14 = vmul.f32 %v771_v9, %v991_v41  ;;  %784 = vpow2.f32 %v426_v51  ;;  %v458_v15 = vmul.f32 1.442695, %v398_v8 }
  0xbe   : > { %v412_v60 = vmul.f32 1.442695, %v375_v20  ;;  %v775_v17 = vpop.eup %774  ;;  %v572_v63 = vpack.c.bf16 %v540_v10, %v540_v10  ;;  %v485_v21 = vadd.f32 1.0, %v773_v13  ;;  %v428_v22 = vmul.f32 1.442695, %v383_v12  ;;  %v342_v26 = vpop.f32.mrf.mxu2 }
  0xbf   : > { %786 = vpow2.f32 %v442_v11  ;;  %v777_v23 = vpop.eup %776  ;;  %v580_v27 = vpack.c.bf16 %v548_v14, %v548_v14  ;;  %v556_v28 = vmul.f32 %v775_v17, %v994_v47  ;;  %v1067_v0 = vadd.f32 %v948_v50, %v342_v26  ;;  %v362_v41 = vpop.f32.mrf.mxu3 }
  0xc0   : > { %788 = vpow2.f32 %v458_v15  ;;  %v305_v30 = vpop.f32.mrf.mxu0  ;;  %v779_v31 = vpop.eup %778  ;;  %605 = vst.msk [vmem:[%s988_s26 + $0x28] sm:$0xf] %vm594_vm2, %v572_v63  ;;  %v533_v32 = vmul.f32 %v777_v23, %v1001_v54  ;;  %v1073_v33 = vadd.f32 %v948_v50, %v362_v41 }
  0xc1   : > { %790 = vrcp.f32 %v485_v21  ;;  %v1076_v34 = vadd.f32 %v948_v50, %v305_v30  ;;  %v325_v47 = vpop.f32.mrf.mxu1  ;;  %v781_v35 = vpop.eup %780  ;;  %613 = vst.msk [vmem:[%s988_s26 + $0x48] sm:$0xf] %vm594_vm2, %v580_v27  ;;  %v588_v36 = vpack.c.bf16 %v556_v28, %v556_v28  ;;  %v493_v37 = vadd.f32 1.0, %v779_v31 }
  0xc2   : > { %792 = vpow2.f32 %v412_v60  ;;  %v391_v3 = vsub.f32 0.0, %v1067_v0  ;;  %v783_v38 = vpop.eup %782  ;;  %v565_v54 = vpack.c.bf16 %v533_v32, %v533_v32  ;;  %v470_v39 = vadd.f32 1.0, %v781_v35 }
  0xc3   : > { %794 = vpow2.f32 %v428_v22  ;;  %v399_v40 = vsub.f32 0.0, %v1073_v33  ;;  %v785_v42 = vpop.eup %784  ;;  %621 = vst.msk [vmem:[%s988_s26 + $0x68] sm:$0xf] %vm594_vm2, %v588_v36  ;;  %v541_v43 = vmul.f32 %v783_v38, %v1004_v55  ;;  %v376_v45 = vsub.f32 0.0, %v1076_v34 }
  0xc4   : > { %796 = vrcp.f32 %v493_v37  ;;  %v444_v44 = vmul.f32 1.442695, %v391_v3  ;;  %598 = vst.msk [vmem:[%s988_s26 + $0xc] sm:$0xf] %vm594_vm2, %v565_v54  ;;  %v478_v48 = vadd.f32 1.0, %v785_v42  ;;  %v1089_v49 = vadd.f32 %v948_v50, %v325_v47 }
  0xc5   : > { %v787_v46 = vpop.eup %786  ;;  %798 = vrcp.f32 %v470_v39  ;;  %v573_v52 = vpack.c.bf16 %v541_v43, %v541_v43  ;;  %v460_v16 = vmul.f32 1.442695, %v399_v40  ;;  %v414_v4 = vmul.f32 1.442695, %v376_v45 }
  0xc6   : > { %v789_v51 = vpop.eup %788  ;;  %v486_v53 = vadd.f32 1.0, %v787_v46  ;;  %800 = vpow2.f32 %v444_v44  ;;  %v384_v59 = vsub.f32 0.0, %v1089_v49  ;;  %v345_v61 = vpop.f32.mrf.mxu2 }
  0xc7   : > { %v791_v56 = vpop.eup %790  ;;  %802 = vrcp.f32 %v478_v48  ;;  %v494_v55 = vadd.f32 1.0, %v789_v51  ;;  %606 = vst.msk [vmem:[%s988_s26 + $0x2c] sm:$0xf] %vm594_vm2, %v573_v52  ;;  %v1096_v5 = vadd.f32 %v948_v50, %v345_v61  ;;  %v365_v6 = vpop.f32.mrf.mxu3 }
  0xc8   : > { %v793_v62 = vpop.eup %792  ;;  %v549_v2 = vmul.f32 %v791_v56, %v1013_v18  ;;  %804 = vrcp.f32 %v486_v53  ;;  %v307_v7 = vpop.f32.mrf.mxu0  ;;  %v430_v9 = vmul.f32 1.442695, %v384_v59  ;;  %v1099_v10 = vadd.f32 %v948_v50, %v365_v6 }
  0xc9   : > { %v795_v8 = vpop.eup %794  ;;  %806 = vrcp.f32 %v494_v55  ;;  %v471_v20 = vadd.f32 1.0, %v793_v62  ;;  %v327_v11 = vpop.f32.mrf.mxu1  ;;  %v392_v18 = vsub.f32 0.0, %v1096_v5  ;;  %v1105_v63 = vadd.f32 %v948_v50, %v307_v7 }
  0xca   : > { %v797_v12 = vpop.eup %796  ;;  %v581_v13 = vpack.c.bf16 %v549_v2, %v549_v2  ;;  %v479_v14 = vadd.f32 1.0, %v795_v8  ;;  %808 = vpow2.f32 %v460_v16  ;;  %v400_v17 = vsub.f32 0.0, %v1099_v10 }
  0xcb   : > { %v799_v15 = vpop.eup %798  ;;  %v557_v60 = vmul.f32 %v797_v12, %v1019_v24  ;;  %810 = vrcp.f32 %v471_v20  ;;  %v446_v26 = vmul.f32 1.442695, %v392_v18  ;;  %v1111_v23 = vadd.f32 %v948_v50, %v327_v11 }
  0xcc   : > { %v801_v21 = vpop.eup %800  ;;  %614 = vst.msk [vmem:[%s988_s26 + $0x4c] sm:$0xf] %vm594_vm2, %v581_v13  ;;  %v534_v22 = vmul.f32 %v799_v15, %v1022_v25  ;;  %812 = vrcp.f32 %v479_v14  ;;  %v462_v41 = vmul.f32 1.442695, %v400_v17  ;;  %v377_v47 = vsub.f32 0.0, %v1105_v63 }
  0xcd   : > { %v803_v27 = vpop.eup %802  ;;  %v589_v28 = vpack.c.bf16 %v557_v60, %v557_v60  ;;  %v487_v24 = vadd.f32 1.0, %v801_v21  ;;  %814 = vpow2.f32 %v414_v4  ;;  %v385_v36 = vsub.f32 0.0, %v1111_v23 }
  0xce   : > { %v805_v30 = vpop.eup %804  ;;  %v566_v31 = vpack.c.bf16 %v534_v22, %v534_v22  ;;  %v542_v32 = vmul.f32 %v803_v27, %v1029_v29  ;;  %816 = vpow2.f32 %v430_v9  ;;  %v347_v37 = vpop.f32.mrf.mxu2  ;;  %v416_v29 = vmul.f32 1.442695, %v377_v47 }
  0xcf   : > { %v807_v35 = vpop.eup %806  ;;  %622 = vst.msk [vmem:[%s988_s26 + $0x6c] sm:$0xf] %vm594_vm2, %v589_v28  ;;  %v550_v25 = vmul.f32 %v805_v30, %v1041_v57  ;;  %818 = vrcp.f32 %v487_v24  ;;  %v367_v39 = vpop.f32.mrf.mxu3  ;;  %v432_v57 = vmul.f32 1.442695, %v385_v36  ;;  %v1126_v48 = vadd.f32 %v948_v50, %v347_v37 }
  0xd0   : > { %v809_v3 = vpop.eup %808  ;;  %599 = vst.msk [vmem:[%s988_s26 + $0x10] sm:$0xf] %vm594_vm2, %v566_v31  ;;  %v574_v38 = vpack.c.bf16 %v542_v32, %v542_v32  ;;  %v558_v54 = vmul.f32 %v807_v35, %v1044_v58  ;;  %820 = vpow2.f32 %v446_v26  ;;  %v1132_v52 = vadd.f32 %v948_v50, %v367_v39 }
  0xd1   : > { %v811_v40 = vpop.eup %810  ;;  %v582_v42 = vpack.c.bf16 %v550_v25, %v550_v25  ;;  %v495_v43 = vadd.f32 1.0, %v809_v3  ;;  %822 = vpow2.f32 %v462_v41  ;;  %v393_v56 = vsub.f32 0.0, %v1126_v48 }
  0xd2   : > { %v813_v44 = vpop.eup %812  ;;  %607 = vst.msk [vmem:[%s988_s26 + $0x30] sm:$0xf] %vm594_vm2, %v574_v38  ;;  %v590_v45 = vpack.c.bf16 %v558_v54, %v558_v54  ;;  %v535_v46 = vmul.f32 %v811_v40, %v1050_v1  ;;  %824 = vpow2.f32 %v416_v29  ;;  %v401_v62 = vsub.f32 0.0, %v1132_v52 }
  0xd3   : > { %v815_v58 = vpop.eup %814  ;;  %615 = vst.msk [vmem:[%s988_s26 + $0x50] sm:$0xf] %vm594_vm2, %v582_v42  ;;  %v543_v51 = vmul.f32 %v813_v44, %v1053_v19  ;;  %826 = vrcp.f32 %v495_v43  ;;  %v448_v19 = vmul.f32 1.442695, %v393_v56 }
  0xd4   : > { %v817_v53 = vpop.eup %816  ;;  %623 = vst.msk [vmem:[%s988_s26 + $0x70] sm:$0xf] %vm594_vm2, %v590_v45  ;;  %v567_v16 = vpack.c.bf16 %v535_v46, %v535_v46  ;;  %v472_v1 = vadd.f32 1.0, %v815_v58  ;;  %828 = vpow2.f32 %v432_v57  ;;  %v464_v9 = vmul.f32 1.442695, %v401_v62 }
  0xd5   : > { %v819_v55 = vpop.eup %818  ;;  %v575_v59 = vpack.c.bf16 %v543_v51, %v543_v51  ;;  %v480_v61 = vadd.f32 1.0, %v817_v53 }
  0xd6   : > { %v821_v2 = vpop.eup %820  ;;  %600 = vst.msk [vmem:[%s988_s26 + $0x14] sm:$0xf] %vm594_vm2, %v567_v16  ;;  %v551_v50 = vmul.f32 %v819_v55, %v1067_v0  ;;  %830 = vrcp.f32 %v472_v1 }
  0xd7   : > { %v823_v4 = vpop.eup %822  ;;  %608 = vst.msk [vmem:[%s988_s26 + $0x34] sm:$0xf] %vm594_vm2, %v575_v59  ;;  %832 = vrcp.f32 %v480_v61  ;;  %v488_v6 = vadd.f32 1.0, %v821_v2 }
  0xd8   : > { %v825_v7 = vpop.eup %824  ;;  %v583_v8 = vpack.c.bf16 %v551_v50, %v551_v50  ;;  %v496_v20 = vadd.f32 1.0, %v823_v4  ;;  %834 = vpow2.f32 %v448_v19 }
  0xd9   : > { %v827_v11 = vpop.eup %826  ;;  %836 = vrcp.f32 %v488_v6  ;;  %v473_v12 = vadd.f32 1.0, %v825_v7 }
  0xda   : > { %v829_v13 = vpop.eup %828  ;;  %616 = vst.msk [vmem:[%s988_s26 + $0x54] sm:$0xf] %vm594_vm2, %v583_v8  ;;  %v559_v0 = vmul.f32 %v827_v11, %v1073_v33  ;;  %838 = vrcp.f32 %v496_v20 }
  0xdb   : > { %840 = vrcp.f32 %v473_v12  ;;  %v481_v14 = vadd.f32 1.0, %v829_v13 }
  0xdc   : > { %v831_v18 = vpop.eup %830  ;;  %v591_v15 = vpack.c.bf16 %v559_v0, %v559_v0  ;;  %842 = vpow2.f32 %v464_v9 }
  0xdd   : > { %v833_v60 = vpop.eup %832  ;;  %v536_v17 = vmul.f32 %v831_v18, %v1076_v34  ;;  %844 = vrcp.f32 %v481_v14 }
  0xde   : > { %v835_v21 = vpop.eup %834  ;;  %624 = vst.msk [vmem:[%s988_s26 + $0x74] sm:$0xf] %vm594_vm2, %v591_v15  ;;  %v544_v22 = vmul.f32 %v833_v60, %v1089_v49 }
  0xdf   : > { %v837_v26 = vpop.eup %836  ;;  %v568_v27 = vpack.c.bf16 %v536_v17, %v536_v17  ;;  %v489_v33 = vadd.f32 1.0, %v835_v21 }
  0xe0   : > { %v839_v28 = vpop.eup %838  ;;  %v576_v24 = vpack.c.bf16 %v544_v22, %v544_v22  ;;  %v552_v41 = vmul.f32 %v837_v26, %v1096_v5 }
  0xe1   : > { %v841_v30 = vpop.eup %840  ;;  %601 = vst.msk [vmem:[%s988_s26 + $0x18] sm:$0xf] %vm594_vm2, %v568_v27  ;;  %v560_v34 = vmul.f32 %v839_v28, %v1099_v10  ;;  %846 = vrcp.f32 %v489_v33 }
  0xe2   : > { %v843_v31 = vpop.eup %842  ;;  %609 = vst.msk [vmem:[%s988_s26 + $0x38] sm:$0xf] %vm594_vm2, %v576_v24  ;;  %v584_v49 = vpack.c.bf16 %v552_v41, %v552_v41  ;;  %v537_v32 = vmul.f32 %v841_v30, %v1105_v63 }
  0xe3   : > { %v845_v47 = vpop.eup %844  ;;  %v592_v35 = vpack.c.bf16 %v560_v34, %v560_v34  ;;  %v497_v25 = vadd.f32 1.0, %v843_v31 }
  0xe4   : > { %617 = vst.msk [vmem:[%s988_s26 + $0x58] sm:$0xf] %vm594_vm2, %v584_v49  ;;  %v569_v5 = vpack.c.bf16 %v537_v32, %v537_v32  ;;  %v545_v36 = vmul.f32 %v845_v47, %v1111_v23 }
  0xe5   : > { %625 = vst.msk [vmem:[%s988_s26 + $0x78] sm:$0xf] %vm594_vm2, %v592_v35  ;;  %848 = vrcp.f32 %v497_v25 }
  0xe6   : > { %602 = vst.msk [vmem:[%s988_s26 + $0x1c] sm:$0xf] %vm594_vm2, %v569_v5  ;;  %v577_v10 = vpack.c.bf16 %v545_v36, %v545_v36 }
  0xe7   : > { %v847_v37 = vpop.eup %846 }
  0xe8   : > { %610 = vst.msk [vmem:[%s988_s26 + $0x3c] sm:$0xf] %vm594_vm2, %v577_v10  ;;  %v553_v63 = vmul.f32 %v847_v37, %v1126_v48 }
  0xea   : > { %v585_v3 = vpack.c.bf16 %v553_v63, %v553_v63 }
  0xeb   : > { %v849_v38 = vpop.eup %848 }
  0xec   : > { %618 = vst.msk [vmem:[%s988_s26 + $0x5c] sm:$0xf] %vm594_vm2, %v585_v3  ;;  %v561_v54 = vmul.f32 %v849_v38, %v1132_v52 }
  0xee   : > { %v593_v29 = vpack.c.bf16 %v561_v54, %v561_v54 }
  0xf0   : > { %626 = vst.msk [vmem:[%s988_s26 + $0x7c] sm:$0xf] %vm594_vm2, %v593_v29 }
  0xf1 PF: > { %s13_s12 = sadd.s32 1, %s856_s12  }
  0xf2   : > { %p10_p4 = scmp.ge.s32.totalorder %s13_s12, 4  }
  0xf4   :  { %12 = sbr.rel (!%p10_p4) target bundleno = 1 (0x1), region = 62 }

</bundles_post_ra>
